<compile_context>
chip_gen: v7x
topology: tpu7x:2x2x1
jax: 0.10.0
libtpu: 0.0.40
codegen_flags: <defaults>
</compile_context>

<pallas_src>
import jax
import jax.numpy as jnp
from jax import lax
from jax.experimental import pallas as pl
from jax.experimental.pallas import tpu as pltpu

EPS = 1e-5


def _round_up(x, m):
    return (x + m - 1) // m * m


def make_kernel(N, H, W, C_out, K, OFF, LACC, LP):
    HW = H * W
    inv_count = 1.0 / float(N * HW)

    def kernel(x_ref, w_ref, b_ref, g_ref, beta_ref, o_ref, xsc):
        # x_ref : (N, H*W)        VMEM  flattened input image(s)
        # w_ref : (C_out*K*K,)    SMEM  flattened conv weights
        # b_ref : (C_out,)        SMEM  conv bias
        # g_ref : (C_out,)        SMEM  BN gamma
        # beta_ref: (C_out,)      SMEM  BN beta
        # o_ref : (C_out, N, LACC) VMEM lane-dense output slab
        # xsc   : (N, LP)         VMEM scratch (zero-padded flat image)

        # 1) in-kernel zero pad: copy the flat image into a zeroed scratch at a
        #    128-aligned offset (single lane-aligned, unmasked store).
        xsc[...] = jnp.zeros_like(xsc)
        xsc[:, OFF:OFF + HW] = x_ref[...]

        # 2) boundary-column masks, built once. In the flat layout a shift by
        #    kw-1 = -1 wraps column 0 into the previous row's last pixel, and
        #    kw-1 = +1 wraps column W-1 into the next row's first pixel; those
        #    taps must contribute zero there (they hit the conv's zero pad).
        pos = lax.broadcasted_iota(jnp.int32, (1, LACC), 1)
        col = pos % W
        mask_l = (col != 0).astype(jnp.float32)
        mask_r = (col != W - 1).astype(jnp.float32)

        # 3) hoist the 9 shifted views out of the channel loop (reused by all
        #    output channels).
        taps = []
        for kh in range(K):
            for kw in range(K):
                s = OFF + (kh - 1) * W + (kw - 1)
                v = xsc[:, s:s + LACC]
                if kw == 0:
                    v = v * mask_l
                elif kw == K - 1:
                    v = v * mask_r
                taps.append(v)

        # 4) per output channel: shifted-MAC conv (VPU) + single-pass BN + ReLU,
        #    stored lane-dense (last dim is a multiple of 128).
        for c in range(C_out):
            acc = taps[0] * w_ref[c * K * K]
            for t in range(1, K * K):
                acc = acc + taps[t] * w_ref[c * K * K + t]
            acc = acc + b_ref[c]
            if LACC != HW:
                # zero the padded tail so it does not pollute the statistics
                acc = acc * (pos < HW).astype(jnp.float32)

            # --- BatchNorm (training mode, batch stats over N,H,W), one pass ---
            s1 = jnp.sum(acc)
            s2 = jnp.sum(acc * acc)
            mean = s1 * inv_count
            var = s2 * inv_count - mean * mean
            scale = lax.rsqrt(var + EPS) * g_ref[c]
            y = (acc - mean) * scale + beta_ref[c]

            # --- ReLU + store ---
            o_ref[c] = jnp.maximum(y, 0.0)

    return kernel


def conv_bn_relu(x, w, b, gamma, beta):
    N, Cin, H, W = x.shape
    assert Cin == 1
    C_out, _, K, K2 = w.shape
    assert K == 3 and K2 == 3

    HW = H * W
    LACC = _round_up(HW, 128)              # lane-dense accumulator width
    OFF = _round_up(W + 1, 128)            # aligned offset, room for negative shifts
    LP = _round_up(OFF + W + 1 + LACC, 128)  # scratch width (room for positive shifts)

    x2d = x.reshape(N, HW).astype(jnp.float32)
    w_flat = w.reshape(-1).astype(jnp.float32)

    out_flat = pl.pallas_call(
        make_kernel(N, H, W, C_out, K, OFF, LACC, LP),
        out_shape=jax.ShapeDtypeStruct((C_out, N, LACC), jnp.float32),
        in_specs=[
            pl.BlockSpec(memory_space=pltpu.MemorySpace.VMEM),   # flat input
            pl.BlockSpec(memory_space=pltpu.MemorySpace.SMEM),   # conv weights
            pl.BlockSpec(memory_space=pltpu.MemorySpace.SMEM),   # conv bias
            pl.BlockSpec(memory_space=pltpu.MemorySpace.SMEM),   # gamma
            pl.BlockSpec(memory_space=pltpu.MemorySpace.SMEM),   # beta
        ],
        out_specs=pl.BlockSpec(memory_space=pltpu.MemorySpace.VMEM),
        scratch_shapes=[pltpu.VMEM((N, LP), jnp.float32)],
    )(x2d, w_flat, b.astype(jnp.float32), gamma.astype(jnp.float32),
      beta.astype(jnp.float32))

    # (C_out, N, LACC) -> (N, C_out, H, W): cheap layout plumbing in the wrapper.
    out = out_flat[:, :, :HW].reshape(C_out, N, H, W).transpose(1, 0, 2, 3)
    return out


def reference(x, w, b, gamma, beta):
    # pure-JAX reference for sanity check
    y = lax.conv_general_dilated(
        x, w, window_strides=(1, 1), padding=((1, 1), (1, 1)),
        dimension_numbers=("NCHW", "OIHW", "NCHW"))
    y = y + b[None, :, None, None]
    mean = jnp.mean(y, axis=(0, 2, 3), keepdims=True)
    var = jnp.mean((y - mean) ** 2, axis=(0, 2, 3), keepdims=True)
    y = (y - mean) * lax.rsqrt(var + EPS)
    y = y * gamma[None, :, None, None] + beta[None, :, None, None]
    return jnp.maximum(y, 0.0)


if __name__ == "__main__":
    key = jax.random.PRNGKey(0)
    kx, kw, kb = jax.random.split(key, 3)

    N, H, W = 2, 16, 16
    C_out, K = 3, 3

    x = jax.random.normal(kx, (N, 1, H, W), dtype=jnp.float32)

    # deterministic parameter init (PyTorch-like uniform scale, fan_in = 1*3*3)
    bound = 1.0 / jnp.sqrt(9.0)
    w = jax.random.uniform(kw, (C_out, 1, K, K), minval=-bound, maxval=bound,
                           dtype=jnp.float32)
    b = jax.random.uniform(kb, (C_out,), minval=-bound, maxval=bound,
                           dtype=jnp.float32)
    gamma = jnp.ones((C_out,), jnp.float32)
    beta = jnp.zeros((C_out,), jnp.float32)

    out = jax.block_until_ready(conv_bn_relu(x, w, b, gamma, beta))
    ref = jax.block_until_ready(reference(x, w, b, gamma, beta))

    assert out.shape == (N, C_out, H, W)
    assert jnp.allclose(out, ref, atol=1e-4, rtol=1e-4), \
        float(jnp.max(jnp.abs(out - ref)))

    print("KERNEL_OK")
</pallas_src>

<mosaic_0001>
module attributes {stable_mosaic.version = 11 : i64} {
  func.func @kernel(%arg0: memref<2x256xf32, #tpu.memory_space<vmem>>, %arg1: memref<27xf32, #tpu.memory_space<smem>>, %arg2: memref<3xf32, #tpu.memory_space<smem>>, %arg3: memref<3xf32, #tpu.memory_space<smem>>, %arg4: memref<3xf32, #tpu.memory_space<smem>>, %arg5: memref<3x2x256xf32, #tpu.memory_space<vmem>>, %arg6: memref<2x512xf32, #tpu.memory_space<vmem>>) attributes {dimension_semantics = [], scalar_prefetch = 0 : i64, scratch_operands = 1 : i64, tpu.core_type = #tpu.core_type<tc>} {
    %cst = arith.constant 0.000000e+00 : f32
    %0 = vector.broadcast %cst : f32 to vector<2x512xf32>
    %c0 = arith.constant 0 : index
    %c0_0 = arith.constant 0 : index
    %1 = vector.load %arg6[%c0, %c0_0] : memref<2x512xf32, #tpu.memory_space<vmem>>, vector<2x512xf32>
    tpu.vector_store %arg6[%c0, %c0_0], %0 {strides = array<i32>} : memref<2x512xf32, #tpu.memory_space<vmem>>, vector<2x512xf32>,
    %c0_1 = arith.constant 0 : index
    %c0_2 = arith.constant 0 : index
    %2 = vector.load %arg0[%c0_1, %c0_2] : memref<2x256xf32, #tpu.memory_space<vmem>>, vector<2x256xf32>
    %c0_3 = arith.constant 0 : index
    %c128 = arith.constant 128 : index
    %3 = vector.load %arg6[%c0_3, %c128] : memref<2x512xf32, #tpu.memory_space<vmem>>, vector<2x256xf32>
    tpu.vector_store %arg6[%c0_3, %c128], %2 {strides = array<i32>} : memref<2x512xf32, #tpu.memory_space<vmem>>, vector<2x256xf32>,
    %4 = tpu.iota {dimensions = array<i32: 1>} : vector<1x256xi32>
    %c16_i32 = arith.constant 16 : i32
    %c0_i32 = arith.constant 0 : i32
    %5 = arith.cmpi eq, %c16_i32, %c0_i32 : i32
    %c1_i32 = arith.constant 1 : i32
    %6 = arith.select %5, %c1_i32, %c16_i32 : i32
    %7 = vector.broadcast %6 : i32 to vector<1x256xi32>
    %8 = arith.remsi %4, %7 : vector<1x256xi32>
    %c0_i32_4 = arith.constant 0 : i32
    %9 = vector.broadcast %c0_i32_4 : i32 to vector<1x256xi32>
    %10 = arith.cmpi ne, %8, %9 : vector<1x256xi32>
    %c0_i32_5 = arith.constant 0 : i32
    %11 = vector.broadcast %c0_i32_5 : i32 to vector<1x256xi32>
    %12 = arith.cmpi slt, %8, %11 : vector<1x256xi32>
    %c0_i32_6 = arith.constant 0 : i32
    %13 = arith.cmpi slt, %6, %c0_i32_6 : i32
    %14 = vector.broadcast %13 : i1 to vector<1x256xi1>
    %15 = vector.broadcast %14 : vector<1x256xi1> to vector<1x256xi1>
    %16 = arith.xori %12, %15 : vector<1x256xi1>
    %17 = arith.andi %16, %10 : vector<1x256xi1>
    %18 = vector.broadcast %6 : i32 to vector<1x256xi32>
    %19 = arith.addi %8, %18 : vector<1x256xi32>
    %20 = arith.select %17, %19, %8 : vector<1x256xi1>, vector<1x256xi32>
    %c0_i32_7 = arith.constant 0 : i32
    %21 = vector.broadcast %c0_i32_7 : i32 to vector<1x256xi32>
    %22 = arith.cmpi ne, %20, %21 : vector<1x256xi32>
    %23 = arith.extui %22 : vector<1x256xi1> to vector<1x256xi32>
    %24 = arith.sitofp %23 : vector<1x256xi32> to vector<1x256xf32>
    %c15_i32 = arith.constant 15 : i32
    %25 = vector.broadcast %c15_i32 : i32 to vector<1x256xi32>
    %26 = arith.cmpi ne, %20, %25 : vector<1x256xi32>
    %27 = arith.extui %26 : vector<1x256xi1> to vector<1x256xi32>
    %28 = arith.sitofp %27 : vector<1x256xi32> to vector<1x256xf32>
    %c0_8 = arith.constant 0 : index
    %c111 = arith.constant 111 : index
    %29 = vector.load %arg6[%c0_8, %c111] : memref<2x512xf32, #tpu.memory_space<vmem>>, vector<2x256xf32>
    %30 = vector.broadcast %24 : vector<1x256xf32> to vector<2x256xf32>
    %31 = arith.mulf %29, %30 : vector<2x256xf32>
    %c0_9 = arith.constant 0 : index
    %c112 = arith.constant 112 : index
    %32 = vector.load %arg6[%c0_9, %c112] : memref<2x512xf32, #tpu.memory_space<vmem>>, vector<2x256xf32>
    %c0_10 = arith.constant 0 : index
    %c113 = arith.constant 113 : index
    %33 = vector.load %arg6[%c0_10, %c113] : memref<2x512xf32, #tpu.memory_space<vmem>>, vector<2x256xf32>
    %34 = vector.broadcast %28 : vector<1x256xf32> to vector<2x256xf32>
    %35 = arith.mulf %33, %34 : vector<2x256xf32>
    %c0_11 = arith.constant 0 : index
    %c127 = arith.constant 127 : index
    %36 = vector.load %arg6[%c0_11, %c127] : memref<2x512xf32, #tpu.memory_space<vmem>>, vector<2x256xf32>
    %37 = vector.broadcast %24 : vector<1x256xf32> to vector<2x256xf32>
    %38 = arith.mulf %36, %37 : vector<2x256xf32>
    %c0_12 = arith.constant 0 : index
    %c128_13 = arith.constant 128 : index
    %39 = vector.load %arg6[%c0_12, %c128_13] : memref<2x512xf32, #tpu.memory_space<vmem>>, vector<2x256xf32>
    %c0_14 = arith.constant 0 : index
    %c129 = arith.constant 129 : index
    %40 = vector.load %arg6[%c0_14, %c129] : memref<2x512xf32, #tpu.memory_space<vmem>>, vector<2x256xf32>
    %41 = vector.broadcast %28 : vector<1x256xf32> to vector<2x256xf32>
    %42 = arith.mulf %40, %41 : vector<2x256xf32>
    %c0_15 = arith.constant 0 : index
    %c143 = arith.constant 143 : index
    %43 = vector.load %arg6[%c0_15, %c143] : memref<2x512xf32, #tpu.memory_space<vmem>>, vector<2x256xf32>
    %44 = vector.broadcast %24 : vector<1x256xf32> to vector<2x256xf32>
    %45 = arith.mulf %43, %44 : vector<2x256xf32>
    %c0_16 = arith.constant 0 : index
    %c144 = arith.constant 144 : index
    %46 = vector.load %arg6[%c0_16, %c144] : memref<2x512xf32, #tpu.memory_space<vmem>>, vector<2x256xf32>
    %c0_17 = arith.constant 0 : index
    %c145 = arith.constant 145 : index
    %47 = vector.load %arg6[%c0_17, %c145] : memref<2x512xf32, #tpu.memory_space<vmem>>, vector<2x256xf32>
    %48 = vector.broadcast %28 : vector<1x256xf32> to vector<2x256xf32>
    %49 = arith.mulf %47, %48 : vector<2x256xf32>
    %c0_18 = arith.constant 0 : index
    %50 = memref.load %arg1[%c0_18] : memref<27xf32, #tpu.memory_space<smem>>
    %51 = vector.broadcast %50 : f32 to vector<2x256xf32>
    %52 = arith.mulf %31, %51 : vector<2x256xf32>
    %c1 = arith.constant 1 : index
    %53 = memref.load %arg1[%c1] : memref<27xf32, #tpu.memory_space<smem>>
    %54 = vector.broadcast %53 : f32 to vector<2x256xf32>
    %55 = arith.mulf %32, %54 : vector<2x256xf32>
    %56 = arith.addf %52, %55 : vector<2x256xf32>
    %c2 = arith.constant 2 : index
    %57 = memref.load %arg1[%c2] : memref<27xf32, #tpu.memory_space<smem>>
    %58 = vector.broadcast %57 : f32 to vector<2x256xf32>
    %59 = arith.mulf %35, %58 : vector<2x256xf32>
    %60 = arith.addf %56, %59 : vector<2x256xf32>
    %c3 = arith.constant 3 : index
    %61 = memref.load %arg1[%c3] : memref<27xf32, #tpu.memory_space<smem>>
    %62 = vector.broadcast %61 : f32 to vector<2x256xf32>
    %63 = arith.mulf %38, %62 : vector<2x256xf32>
    %64 = arith.addf %60, %63 : vector<2x256xf32>
    %c4 = arith.constant 4 : index
    %65 = memref.load %arg1[%c4] : memref<27xf32, #tpu.memory_space<smem>>
    %66 = vector.broadcast %65 : f32 to vector<2x256xf32>
    %67 = arith.mulf %39, %66 : vector<2x256xf32>
    %68 = arith.addf %64, %67 : vector<2x256xf32>
    %c5 = arith.constant 5 : index
    %69 = memref.load %arg1[%c5] : memref<27xf32, #tpu.memory_space<smem>>
    %70 = vector.broadcast %69 : f32 to vector<2x256xf32>
    %71 = arith.mulf %42, %70 : vector<2x256xf32>
    %72 = arith.addf %68, %71 : vector<2x256xf32>
    %c6 = arith.constant 6 : index
    %73 = memref.load %arg1[%c6] : memref<27xf32, #tpu.memory_space<smem>>
    %74 = vector.broadcast %73 : f32 to vector<2x256xf32>
    %75 = arith.mulf %45, %74 : vector<2x256xf32>
    %76 = arith.addf %72, %75 : vector<2x256xf32>
    %c7 = arith.constant 7 : index
    %77 = memref.load %arg1[%c7] : memref<27xf32, #tpu.memory_space<smem>>
    %78 = vector.broadcast %77 : f32 to vector<2x256xf32>
    %79 = arith.mulf %46, %78 : vector<2x256xf32>
    %80 = arith.addf %76, %79 : vector<2x256xf32>
    %c8 = arith.constant 8 : index
    %81 = memref.load %arg1[%c8] : memref<27xf32, #tpu.memory_space<smem>>
    %82 = vector.broadcast %81 : f32 to vector<2x256xf32>
    %83 = arith.mulf %49, %82 : vector<2x256xf32>
    %84 = arith.addf %80, %83 : vector<2x256xf32>
    %c0_19 = arith.constant 0 : index
    %85 = memref.load %arg2[%c0_19] : memref<3xf32, #tpu.memory_space<smem>>
    %86 = vector.broadcast %85 : f32 to vector<2x256xf32>
    %87 = arith.addf %84, %86 : vector<2x256xf32>
    %88 = vector.shape_cast %87 : vector<2x256xf32> to vector<1x2x256xf32>
    %cst_20 = arith.constant dense<0.000000e+00> : vector<1xf32>
    %89 = vector.multi_reduction <add>, %88, %cst_20 [1, 2] : vector<1x2x256xf32> to vector<1xf32>
    %90 = vector.shape_cast %89 : vector<1xf32> to vector<1x1x1xf32>
    %91 = vector.extract %90[0, 0, 0] : f32 from vector<1x1x1xf32>
    %92 = arith.mulf %87, %87 : vector<2x256xf32>
    %93 = vector.shape_cast %92 : vector<2x256xf32> to vector<1x2x256xf32>
    %cst_21 = arith.constant dense<0.000000e+00> : vector<1xf32>
    %94 = vector.multi_reduction <add>, %93, %cst_21 [1, 2] : vector<1x2x256xf32> to vector<1xf32>
    %95 = vector.shape_cast %94 : vector<1xf32> to vector<1x1x1xf32>
    %96 = vector.extract %95[0, 0, 0] : f32 from vector<1x1x1xf32>
    %cst_22 = arith.constant 0.001953125 : f32
    %97 = arith.mulf %91, %cst_22 : f32
    %cst_23 = arith.constant 0.001953125 : f32
    %98 = arith.mulf %96, %cst_23 : f32
    %99 = arith.mulf %97, %97 : f32
    %100 = arith.subf %98, %99 : f32
    %cst_24 = arith.constant 9.99999974E-6 : f32
    %101 = arith.addf %100, %cst_24 : f32
    %102 = math.rsqrt %101 : f32
    %c0_25 = arith.constant 0 : index
    %103 = memref.load %arg3[%c0_25] : memref<3xf32, #tpu.memory_space<smem>>
    %104 = arith.mulf %102, %103 : f32
    %105 = vector.broadcast %97 : f32 to vector<2x256xf32>
    %106 = arith.subf %87, %105 : vector<2x256xf32>
    %107 = vector.broadcast %104 : f32 to vector<2x256xf32>
    %108 = arith.mulf %106, %107 : vector<2x256xf32>
    %c0_26 = arith.constant 0 : index
    %109 = memref.load %arg4[%c0_26] : memref<3xf32, #tpu.memory_space<smem>>
    %110 = vector.broadcast %109 : f32 to vector<2x256xf32>
    %111 = arith.addf %108, %110 : vector<2x256xf32>
    %cst_27 = arith.constant 0.000000e+00 : f32
    %112 = vector.broadcast %cst_27 : f32 to vector<2x256xf32>
    %113 = arith.maximumf %111, %112 : vector<2x256xf32>
    %c0_28 = arith.constant 0 : index
    %c0_29 = arith.constant 0 : index
    %c0_30 = arith.constant 0 : index
    %114 = vector.load %arg5[%c0_28, %c0_29, %c0_30] : memref<3x2x256xf32, #tpu.memory_space<vmem>>, vector<1x2x256xf32>
    %115 = vector.shape_cast %114 : vector<1x2x256xf32> to vector<2x256xf32>
    %116 = vector.shape_cast %113 : vector<2x256xf32> to vector<1x2x256xf32>
    tpu.vector_store %arg5[%c0_28, %c0_29, %c0_30], %116 {strides = array<i32>} : memref<3x2x256xf32, #tpu.memory_space<vmem>>, vector<1x2x256xf32>,
    %c9 = arith.constant 9 : index
    %117 = memref.load %arg1[%c9] : memref<27xf32, #tpu.memory_space<smem>>
    %118 = vector.broadcast %117 : f32 to vector<2x256xf32>
    %119 = arith.mulf %31, %118 : vector<2x256xf32>
    %c10 = arith.constant 10 : index
    %120 = memref.load %arg1[%c10] : memref<27xf32, #tpu.memory_space<smem>>
    %121 = vector.broadcast %120 : f32 to vector<2x256xf32>
    %122 = arith.mulf %32, %121 : vector<2x256xf32>
    %123 = arith.addf %119, %122 : vector<2x256xf32>
    %c11 = arith.constant 11 : index
    %124 = memref.load %arg1[%c11] : memref<27xf32, #tpu.memory_space<smem>>
    %125 = vector.broadcast %124 : f32 to vector<2x256xf32>
    %126 = arith.mulf %35, %125 : vector<2x256xf32>
    %127 = arith.addf %123, %126 : vector<2x256xf32>
    %c12 = arith.constant 12 : index
    %128 = memref.load %arg1[%c12] : memref<27xf32, #tpu.memory_space<smem>>
    %129 = vector.broadcast %128 : f32 to vector<2x256xf32>
    %130 = arith.mulf %38, %129 : vector<2x256xf32>
    %131 = arith.addf %127, %130 : vector<2x256xf32>
    %c13 = arith.constant 13 : index
    %132 = memref.load %arg1[%c13] : memref<27xf32, #tpu.memory_space<smem>>
    %133 = vector.broadcast %132 : f32 to vector<2x256xf32>
    %134 = arith.mulf %39, %133 : vector<2x256xf32>
    %135 = arith.addf %131, %134 : vector<2x256xf32>
    %c14 = arith.constant 14 : index
    %136 = memref.load %arg1[%c14] : memref<27xf32, #tpu.memory_space<smem>>
    %137 = vector.broadcast %136 : f32 to vector<2x256xf32>
    %138 = arith.mulf %42, %137 : vector<2x256xf32>
    %139 = arith.addf %135, %138 : vector<2x256xf32>
    %c15 = arith.constant 15 : index
    %140 = memref.load %arg1[%c15] : memref<27xf32, #tpu.memory_space<smem>>
    %141 = vector.broadcast %140 : f32 to vector<2x256xf32>
    %142 = arith.mulf %45, %141 : vector<2x256xf32>
    %143 = arith.addf %139, %142 : vector<2x256xf32>
    %c16 = arith.constant 16 : index
    %144 = memref.load %arg1[%c16] : memref<27xf32, #tpu.memory_space<smem>>
    %145 = vector.broadcast %144 : f32 to vector<2x256xf32>
    %146 = arith.mulf %46, %145 : vector<2x256xf32>
    %147 = arith.addf %143, %146 : vector<2x256xf32>
    %c17 = arith.constant 17 : index
    %148 = memref.load %arg1[%c17] : memref<27xf32, #tpu.memory_space<smem>>
    %149 = vector.broadcast %148 : f32 to vector<2x256xf32>
    %150 = arith.mulf %49, %149 : vector<2x256xf32>
    %151 = arith.addf %147, %150 : vector<2x256xf32>
    %c1_31 = arith.constant 1 : index
    %152 = memref.load %arg2[%c1_31] : memref<3xf32, #tpu.memory_space<smem>>
    %153 = vector.broadcast %152 : f32 to vector<2x256xf32>
    %154 = arith.addf %151, %153 : vector<2x256xf32>
    %155 = vector.shape_cast %154 : vector<2x256xf32> to vector<1x2x256xf32>
    %cst_32 = arith.constant dense<0.000000e+00> : vector<1xf32>
    %156 = vector.multi_reduction <add>, %155, %cst_32 [1, 2] : vector<1x2x256xf32> to vector<1xf32>
    %157 = vector.shape_cast %156 : vector<1xf32> to vector<1x1x1xf32>
    %158 = vector.extract %157[0, 0, 0] : f32 from vector<1x1x1xf32>
    %159 = arith.mulf %154, %154 : vector<2x256xf32>
    %160 = vector.shape_cast %159 : vector<2x256xf32> to vector<1x2x256xf32>
    %cst_33 = arith.constant dense<0.000000e+00> : vector<1xf32>
    %161 = vector.multi_reduction <add>, %160, %cst_33 [1, 2] : vector<1x2x256xf32> to vector<1xf32>
    %162 = vector.shape_cast %161 : vector<1xf32> to vector<1x1x1xf32>
    %163 = vector.extract %162[0, 0, 0] : f32 from vector<1x1x1xf32>
    %cst_34 = arith.constant 0.001953125 : f32
    %164 = arith.mulf %158, %cst_34 : f32
    %cst_35 = arith.constant 0.001953125 : f32
    %165 = arith.mulf %163, %cst_35 : f32
    %166 = arith.mulf %164, %164 : f32
    %167 = arith.subf %165, %166 : f32
    %cst_36 = arith.constant 9.99999974E-6 : f32
    %168 = arith.addf %167, %cst_36 : f32
    %169 = math.rsqrt %168 : f32
    %c1_37 = arith.constant 1 : index
    %170 = memref.load %arg3[%c1_37] : memref<3xf32, #tpu.memory_space<smem>>
    %171 = arith.mulf %169, %170 : f32
    %172 = vector.broadcast %164 : f32 to vector<2x256xf32>
    %173 = arith.subf %154, %172 : vector<2x256xf32>
    %174 = vector.broadcast %171 : f32 to vector<2x256xf32>
    %175 = arith.mulf %173, %174 : vector<2x256xf32>
    %c1_38 = arith.constant 1 : index
    %176 = memref.load %arg4[%c1_38] : memref<3xf32, #tpu.memory_space<smem>>
    %177 = vector.broadcast %176 : f32 to vector<2x256xf32>
    %178 = arith.addf %175, %177 : vector<2x256xf32>
    %cst_39 = arith.constant 0.000000e+00 : f32
    %179 = vector.broadcast %cst_39 : f32 to vector<2x256xf32>
    %180 = arith.maximumf %178, %179 : vector<2x256xf32>
    %c1_40 = arith.constant 1 : index
    %c0_41 = arith.constant 0 : index
    %c0_42 = arith.constant 0 : index
    %181 = vector.load %arg5[%c1_40, %c0_41, %c0_42] : memref<3x2x256xf32, #tpu.memory_space<vmem>>, vector<1x2x256xf32>
    %182 = vector.shape_cast %181 : vector<1x2x256xf32> to vector<2x256xf32>
    %183 = vector.shape_cast %180 : vector<2x256xf32> to vector<1x2x256xf32>
    tpu.vector_store %arg5[%c1_40, %c0_41, %c0_42], %183 {strides = array<i32>} : memref<3x2x256xf32, #tpu.memory_space<vmem>>, vector<1x2x256xf32>,
    %c18 = arith.constant 18 : index
    %184 = memref.load %arg1[%c18] : memref<27xf32, #tpu.memory_space<smem>>
    %185 = vector.broadcast %184 : f32 to vector<2x256xf32>
    %186 = arith.mulf %31, %185 : vector<2x256xf32>
    %c19 = arith.constant 19 : index
    %187 = memref.load %arg1[%c19] : memref<27xf32, #tpu.memory_space<smem>>
    %188 = vector.broadcast %187 : f32 to vector<2x256xf32>
    %189 = arith.mulf %32, %188 : vector<2x256xf32>
    %190 = arith.addf %186, %189 : vector<2x256xf32>
    %c20 = arith.constant 20 : index
    %191 = memref.load %arg1[%c20] : memref<27xf32, #tpu.memory_space<smem>>
    %192 = vector.broadcast %191 : f32 to vector<2x256xf32>
    %193 = arith.mulf %35, %192 : vector<2x256xf32>
    %194 = arith.addf %190, %193 : vector<2x256xf32>
    %c21 = arith.constant 21 : index
    %195 = memref.load %arg1[%c21] : memref<27xf32, #tpu.memory_space<smem>>
    %196 = vector.broadcast %195 : f32 to vector<2x256xf32>
    %197 = arith.mulf %38, %196 : vector<2x256xf32>
    %198 = arith.addf %194, %197 : vector<2x256xf32>
    %c22 = arith.constant 22 : index
    %199 = memref.load %arg1[%c22] : memref<27xf32, #tpu.memory_space<smem>>
    %200 = vector.broadcast %199 : f32 to vector<2x256xf32>
    %201 = arith.mulf %39, %200 : vector<2x256xf32>
    %202 = arith.addf %198, %201 : vector<2x256xf32>
    %c23 = arith.constant 23 : index
    %203 = memref.load %arg1[%c23] : memref<27xf32, #tpu.memory_space<smem>>
    %204 = vector.broadcast %203 : f32 to vector<2x256xf32>
    %205 = arith.mulf %42, %204 : vector<2x256xf32>
    %206 = arith.addf %202, %205 : vector<2x256xf32>
    %c24 = arith.constant 24 : index
    %207 = memref.load %arg1[%c24] : memref<27xf32, #tpu.memory_space<smem>>
    %208 = vector.broadcast %207 : f32 to vector<2x256xf32>
    %209 = arith.mulf %45, %208 : vector<2x256xf32>
    %210 = arith.addf %206, %209 : vector<2x256xf32>
    %c25 = arith.constant 25 : index
    %211 = memref.load %arg1[%c25] : memref<27xf32, #tpu.memory_space<smem>>
    %212 = vector.broadcast %211 : f32 to vector<2x256xf32>
    %213 = arith.mulf %46, %212 : vector<2x256xf32>
    %214 = arith.addf %210, %213 : vector<2x256xf32>
    %c26 = arith.constant 26 : index
    %215 = memref.load %arg1[%c26] : memref<27xf32, #tpu.memory_space<smem>>
    %216 = vector.broadcast %215 : f32 to vector<2x256xf32>
    %217 = arith.mulf %49, %216 : vector<2x256xf32>
    %218 = arith.addf %214, %217 : vector<2x256xf32>
    %c2_43 = arith.constant 2 : index
    %219 = memref.load %arg2[%c2_43] : memref<3xf32, #tpu.memory_space<smem>>
    %220 = vector.broadcast %219 : f32 to vector<2x256xf32>
    %221 = arith.addf %218, %220 : vector<2x256xf32>
    %222 = vector.shape_cast %221 : vector<2x256xf32> to vector<1x2x256xf32>
    %cst_44 = arith.constant dense<0.000000e+00> : vector<1xf32>
    %223 = vector.multi_reduction <add>, %222, %cst_44 [1, 2] : vector<1x2x256xf32> to vector<1xf32>
    %224 = vector.shape_cast %223 : vector<1xf32> to vector<1x1x1xf32>
    %225 = vector.extract %224[0, 0, 0] : f32 from vector<1x1x1xf32>
    %226 = arith.mulf %221, %221 : vector<2x256xf32>
    %227 = vector.shape_cast %226 : vector<2x256xf32> to vector<1x2x256xf32>
    %cst_45 = arith.constant dense<0.000000e+00> : vector<1xf32>
    %228 = vector.multi_reduction <add>, %227, %cst_45 [1, 2] : vector<1x2x256xf32> to vector<1xf32>
    %229 = vector.shape_cast %228 : vector<1xf32> to vector<1x1x1xf32>
    %230 = vector.extract %229[0, 0, 0] : f32 from vector<1x1x1xf32>
    %cst_46 = arith.constant 0.001953125 : f32
    %231 = arith.mulf %225, %cst_46 : f32
    %cst_47 = arith.constant 0.001953125 : f32
    %232 = arith.mulf %230, %cst_47 : f32
    %233 = arith.mulf %231, %231 : f32
    %234 = arith.subf %232, %233 : f32
    %cst_48 = arith.constant 9.99999974E-6 : f32
    %235 = arith.addf %234, %cst_48 : f32
    %236 = math.rsqrt %235 : f32
    %c2_49 = arith.constant 2 : index
    %237 = memref.load %arg3[%c2_49] : memref<3xf32, #tpu.memory_space<smem>>
    %238 = arith.mulf %236, %237 : f32
    %239 = vector.broadcast %231 : f32 to vector<2x256xf32>
    %240 = arith.subf %221, %239 : vector<2x256xf32>
    %241 = vector.broadcast %238 : f32 to vector<2x256xf32>
    %242 = arith.mulf %240, %241 : vector<2x256xf32>
    %c2_50 = arith.constant 2 : index
    %243 = memref.load %arg4[%c2_50] : memref<3xf32, #tpu.memory_space<smem>>
    %244 = vector.broadcast %243 : f32 to vector<2x256xf32>
    %245 = arith.addf %242, %244 : vector<2x256xf32>
    %cst_51 = arith.constant 0.000000e+00 : f32
    %246 = vector.broadcast %cst_51 : f32 to vector<2x256xf32>
    %247 = arith.maximumf %245, %246 : vector<2x256xf32>
    %c2_52 = arith.constant 2 : index
    %c0_53 = arith.constant 0 : index
    %c0_54 = arith.constant 0 : index
    %248 = vector.load %arg5[%c2_52, %c0_53, %c0_54] : memref<3x2x256xf32, #tpu.memory_space<vmem>>, vector<1x2x256xf32>
    %249 = vector.shape_cast %248 : vector<1x2x256xf32> to vector<2x256xf32>
    %250 = vector.shape_cast %247 : vector<2x256xf32> to vector<1x2x256xf32>
    tpu.vector_store %arg5[%c2_52, %c0_53, %c0_54], %250 {strides = array<i32>} : memref<3x2x256xf32, #tpu.memory_space<vmem>>, vector<1x2x256xf32>,
    return
  }
}

</mosaic_0001>

<bundles_post_ra>
// kernel: tpu_custom_call.1
= control target key start
LH: loop header
LB: loop body
LE: loop exit
PB: predicated region body
PF: predicated region fallthrough
CT: control target
= control target key end

     0   :  { %10 = vsyncpa [#allocation4], 0  ;;  %s1300_s0 = inlined_call_operand.hbm [shape: f32[2,256], index: 0, kind: input, shape index: {}]   ;;  %s1301_s1 = inlined_call_operand.vmem [shape: f32[27], index: 1, kind: input, shape index: {}]   ;;  %s1302_s2 = inlined_call_operand.vmem [shape: f32[3], index: 2, kind: input, shape index: {}]   ;;  %s1303_s3 = inlined_call_operand.vmem [shape: f32[3], index: 3, kind: input, shape index: {}]   ;;  %s1304_s4 = inlined_call_operand.vmem [shape: f32[3], index: 4, kind: input, shape index: {}]   ;;  %s1305_s5 = inlined_call_operand.hbm [shape: f32[3,2,256], index: 5, kind: output, shape index: {}]  }
   0x1   :  { %11 = vsyncpa [#allocation6], 0 }
   0x2   :  { %12 = vsyncpa [#allocation9], 0 }
   0x3   :  { %13 = vsyncpa [#allocation12], 0  ;;  %s41_s20 = sshll.u32 %s1302_s2, 4  ;;  %s42_s20 = int_to_ptr.vmem [resolvable:$true] %s41_s20 }
   0x4   :  { %14 = vsyncpa [#allocation5], 0  ;;  %s869_s21 = scalar_lea.vmem %s42_s20, 16  ;;  %p874_p1 = scmp.lt.s32.totalorder %s42_s20, %s42_s20 }
   0x5   :  { %p870_p0 = scmp.ne.s32.totalorder %s42_s20, %s869_s21  ;;  %p875_p2 = scmp.lt.s32.totalorder %s869_s21, %s869_s21 }
   0x7   :  { %p876_p3 = por %p875_p2, %p874_p1 }
   0x9   :  { %p877_p4 = pnand %p876_p3, %p870_p0 }
   0xb   :  { %880 = shalt.err (!%p877_p4)
}
   0xc   :  { %s971_s22 = smov [#allocation8]   ;;  %s972_s23 = smov [#allocation3]  }
   0xd   :  { %44 = dma.vmem_to_smem %s42_s20, 16, %s971_s22, [#allocation9]  }
   0xe   :  { %s21_s24 = sshll.u32 %s972_s23, 4  ;;  %s31_s27 = sshll.u32 %s1301_s1, 4  ;;  %s22_s24 = int_to_ptr.vmem [resolvable:$true] %s21_s24  ;;  %s32_s27 = int_to_ptr.vmem [resolvable:$true] %s31_s27 }
   0xf   :  { %s881_s29 = scalar_lea.hbm %s1300_s0, 64 }
  0x10   :  { %p882_p5 = scmp.ne.s32.totalorder %s1300_s0, %s881_s29  ;;  %p885_p6 = scmp.lt.u32.totalorder %s881_s29, %s1300_s0 }
  0x12   :  { %p887_p7 = pnand %p885_p6, %p882_p5 }
  0x14   :  { %890 = shalt.err (!%p887_p7)
}
  0x15   :  { %s891_s9 = scalar_lea.vmem %s22_s24, 64  ;;  %p896_p9 = scmp.lt.s32.totalorder %s22_s24, %s22_s24 }
  0x16   :  { %p892_p8 = scmp.ne.s32.totalorder %s22_s24, %s891_s9  ;;  %p897_p10 = scmp.lt.s32.totalorder %s891_s9, %s891_s9 }
  0x18   :  { %p898_p11 = por %p897_p10, %p896_p9 }
  0x1a   :  { %p899_p12 = pnand %p898_p11, %p892_p8 }
  0x1c   :  { %902 = shalt.err (!%p899_p12)
}
  0x1d   :  { %24 = dma.hbm_to_vmem [thread:$0]  %s1300_s0, 64, %s22_s24, [#allocation4]  }
  0x1e   :  { %s51_s13 = sshll.u32 %s1303_s3, 4  ;;  %s903_s14 = scalar_lea.vmem %s32_s27, 16  ;;  %s52_s13 = int_to_ptr.vmem [resolvable:$true] %s51_s13 }
  0x1f   :  { %p904_p13 = scmp.ne.s32.totalorder %s32_s27, %s903_s14  ;;  %p908_p0 = scmp.lt.s32.totalorder %s32_s27, %s32_s27 }
  0x20   :  { %p909_p1 = scmp.lt.s32.totalorder %s903_s14, %s903_s14 }
  0x22   :  { %p910_p2 = por %p909_p1, %p908_p0 }
  0x24   :  { %p911_p3 = pnand %p910_p2, %p904_p13 }
  0x26   :  { %914 = shalt.err (!%p911_p3)
}
  0x27   :  { %s973_s15 = smov [#allocation7]   ;;  %s915_s16 = scalar_lea.vmem %s52_s13, 16 }
  0x28   :  { %34 = dma.vmem_to_smem %s32_s27, 16, %s973_s15, [#allocation6]  }
  0x29   :  { %p916_p4 = scmp.ne.s32.totalorder %s52_s13, %s915_s16  ;;  %p920_p5 = scmp.lt.s32.totalorder %s52_s13, %s52_s13 }
  0x2a   :  { %p921_p6 = scmp.lt.s32.totalorder %s915_s16, %s915_s16 }
  0x2c   :  { %p922_p7 = por %p921_p6, %p920_p5 }
  0x2e   :  { %p923_p8 = pnand %p922_p7, %p916_p4 }
  0x30   :  { %926 = shalt.err (!%p923_p8)
}
  0x31   :  { %s974_s0 = smov [#allocation10]   ;;  %s61_s18 = sshll.u32 %s1304_s4, 4  ;;  %s62_s18 = int_to_ptr.vmem [resolvable:$true] %s61_s18 }
  0x32   :  { %54 = dma.vmem_to_smem %s52_s13, 16, %s974_s0, [#allocation9]  }
  0x33   :  { %s927_s19 = scalar_lea.vmem %s62_s18, 16  ;;  %p932_p10 = scmp.lt.s32.totalorder %s62_s18, %s62_s18 }
  0x34   :  { %p928_p9 = scmp.ne.s32.totalorder %s62_s18, %s927_s19  ;;  %p933_p11 = scmp.lt.s32.totalorder %s927_s19, %s927_s19 }
  0x36   :  { %p934_p12 = por %p933_p11, %p932_p10 }
  0x38   :  { %p935_p13 = pnand %p934_p12, %p928_p9 }
  0x3a   :  { %938 = shalt.err (!%p935_p13)
}
  0x3b   :  { %s975_s20 = smov [#allocation11]  }
  0x3c   :  { %64 = dma.vmem_to_smem %s62_s18, 16, %s975_s20, [#allocation12]  }
  0x3d   :  { %961 = dma.done.wait [#allocation4], 64  }
  0x3e   :  { %962 = vsyncadd [#allocation4], 4294967232 }
  0x3f   :  { %963 = dma.done.wait [#allocation6], 16  }
  0x40   :  { %964 = vsyncadd [#allocation6], 4294967280 }
  0x41   :  { %965 = dma.done.wait [#allocation9], 32  }
  0x42   :  { %966 = vsyncadd [#allocation9], 4294967264 }
  0x43   :  { %967 = dma.done.wait [#allocation12], 16  }
  0x44   :  { %968 = vsyncadd [#allocation12], 4294967280 }
  0x45   :  { %80 = sfence }
  0x46   :  { %v82_v0 = vld [vmem:[#allocation3] sm:$0xf]  ;;  %v84_v1 = vlaneseq  ;;  %v976_v2 = vmov 1983009808   ;;  %v977_v4 = vmov 0.0   ;;  %s791_s4 = sld [smem:[#allocation7 + $0x1]] }
  0x47   :  { %v128_v3 = vunpack.c.l.s4 %v976_v2  ;;  %81 = vst [vmem:[#allocation2] sm:$0xff] %v977_v4  ;;  %s978_s21 = smov 113   ;;  %s979_s22 = smov 1   ;;  %vm154_vm4 = vcmask 924672   ;;  %vm170_vm5 = vcmask 7168   ;;  %vm161_vm6 = vcmask 1039360  }
  0x48   :  { %v85_v5 = vand.u32 127, %v84_v1  ;;  %83 = vst [vmem:[#allocation2 + $0x2] sm:$0xf] %v82_v0  ;;  %v131_v9 = vshrl.u32 %v84_v1, 7  ;;  %s980_s23 = smov 127   ;;  %s981_s24 = smov 15  }
  0x49   :  { %v129_v8 = vunpack.c.0.s8 %v128_v3  ;;  %s982_s25 = smov 17   ;;  %s983_s26 = smov 111   ;;  %vm177_vm7 = vcmask 121856   ;;  %vm184_vm8 = vcmask 138240   ;;  %vm137_vm9 = vcmask 908288  }
  0x4a   :  { %v86_v6 = vadd.s32 128, %v85_v5  ;;  %v91_v7 = vand.u32 15, %v85_v5  ;;  %s792_s27 = sld [smem:[#allocation7 + $0x2]]  ;;  %s1058_s2 = sld [smem:[#allocation7 + $0x4]]  ;;  %vm208_vm10 = vcmask 1031168   ;;  %vm219_vm11 = vcmask 916480  }
  0x4b   :  { %v1047_v13 = vsub.s32 %v129_v8, %v131_v9  ;;  %s1060_s28 = sld [smem:[#allocation7 + $0x3]]  ;;  %s1062_s29 = sld [smem:[#allocation7 + $0x6]]  ;;  %vm240_vm12 = vcmask 900096   ;;  %vm251_vm13 = vcmask 785408   ;;  %vm262_vm14 = vcmask 777216  }
  0x4c   :  { %v98_v10 = vand.u32 15, %v86_v6  ;;  %vm117_vm0 = vcmp.ne.s32.totalorder %v91_v7, 15  ;;  %vm111_vm1 = vcmp.ne.s32.totalorder %v91_v7, 0  ;;  %v192_v21 = vstv %s791_s4  ;;  %s1064_s30 = sld [smem:[#allocation7 + $0x5]]  ;;  %s1072_s6 = sld [smem:[#allocation7 + $0x7]] }
  0x4d   :  { %v789_v11 = vsel %vm117_vm0, 1.0, %v977_v4  ;;  %v787_v12 = vsel %vm111_vm1, 1.0, %v977_v4  ;;  %s1074_s7 = sld [smem:[#allocation7 + $0x8]]  ;;  %s984_s8 = smov 126   ;;  %vm273_vm15 = vcmask 769024   ;;  %vm307_vm0 = vcmask 1041408  }
  0x4e   :  { %vm118_vm2 = vcmp.ne.s32.totalorder %v98_v10, 15  ;;  %vm112_vm3 = vcmp.ne.s32.totalorder %v98_v10, 0  ;;  %s1090_s9 = sld [smem:[#allocation7 + $0xa]]  ;;  %s803_s1 = sld [smem:[#allocation7 + $0xd]] }
  0x4f   :  { %v790_v14 = vsel %vm118_vm2, 1.0, %v977_v4  ;;  %v788_v15 = vsel %vm112_vm3, 1.0, %v977_v4  ;;  %v1052_v20 = vld [vmem:[#allocation2] sm:$0x3f]  ;;  %s985_s10 = smov 112   ;;  %s806_s11 = sld [smem:[#allocation7 + $0x10]] }
  0x50   :  { %v143_v16 = vcombine.low %v789_v11, %v790_v14  ;;  %v126_v17 = vcombine.low %v787_v12, %v788_v15  ;;  %v193_v22 = vmul.f32 %v192_v21, %v1052_v20  ;;  %v202_v28 = vstv %s792_s27  ;;  %v1069_v32 = vld [vmem:[#allocation2 + $0x2] sm:$0xf]  ;;  %s801_s12 = sld [smem:[#allocation7 + $0xb]]  ;;  %s986_s13 = smov 110  }
  0x51   :  { %v224_v35 = vstv %s1058_s2  ;;  %v1077_v37 = vld [vmem:[#allocation2 + $0x2] sm:$0x3f]  ;;  %v213_v41 = vstv %s1060_s28  ;;  %v245_v47 = vstv %s1062_s29  ;;  %s987_s14 = smov 96   ;;  %s812_s15 = sld [smem:[#allocation7 + $0x13]] }
  0x52   :  { %v150_v18 = vrot.slane %v143_v16, %v1047_v13  ;;  %v133_v19 = vrot.slane %v126_v17, %v1047_v13  ;;  %v225_v45 = vmul.f32 %v224_v35, %v1069_v32  ;;  %v234_v51 = vstv %s1064_s30  ;;  %s805_s16 = sld [smem:[#allocation7 + $0xf]]  ;;  %s988_s0 = smov 95  }
  0x53   :  { %v256_v54 = vstv %s1072_s6  ;;  %v267_v55 = vstv %s1074_s7  ;;  %s989_s3 = smov 94   ;;  %s802_s17 = sld [smem:[#allocation7 + $0xc]] }
  0x54   :  { %151 = vrot.lane.b32.xlu0 %v150_v18, %s978_s21  ;;  %167 = vrot.lane.b32.xlu1 %v150_v18, %s979_s22  ;;  %v257_v57 = vmul.f32 %v256_v54, %v1077_v37  ;;  %v389_v59 = vstv %s1090_s9  ;;  %v419_v60 = vstv %s803_s1  ;;  %s813_s18 = sld [smem:[#allocation7 + $0x14]]  ;;  %s804_s19 = sld [smem:[#allocation7 + $0xe]] }
  0x55   :  { %v390_v61 = vmul.f32 %v389_v59, %v1052_v20  ;;  %v420_v62 = vmul.f32 %v419_v60, %v1069_v32  ;;  %v449_v63 = vstv %s806_s11  ;;  %s807_s20 = sld [smem:[#allocation7 + $0x11]]  ;;  %s188_s4 = sld [smem:[#allocation7]] }
  0x56   :  { %v399_v0 = vstv %s801_s12  ;;  %v450_v1 = vmul.f32 %v449_v63, %v1077_v37  ;;  %s277_s21 = sld [smem:[#allocation8]]  ;;  %s799_s22 = sld [smem:[#allocation7 + $0x9]] }
  0x57   :  { %v580_v2 = vstv %s812_s15  ;;  %s1159_s27 = sld [smem:[#allocation7 + $0x16]]  ;;  %s1170_s2 = sld [smem:[#allocation7 + $0x17]] }
  0x58   :  { %158 = vrot.lane.b32.xlu0 %v133_v19, %s980_s23  ;;  %174 = vrot.lane.b32.xlu1 %v133_v19, %s981_s24  ;;  %v439_v4 = vstv %s805_s16  ;;  %v581_v5 = vmul.f32 %v580_v2, %v1052_v20  ;;  %s1151_s24 = sld [smem:[#allocation7 + $0x15]]  ;;  %s1173_s28 = sld [smem:[#allocation7 + $0x18]] }
  0x59   :  { %v409_v7 = vstv %s802_s17  ;;  %s1176_s29 = sld [smem:[#allocation7 + $0x19]]  ;;  %s819_s6 = sld [smem:[#allocation7 + $0x1a]] }
  0x5a   :  { %v590_v8 = vstv %s813_s18  ;;  %v429_v11 = vstv %s804_s19  ;;  %s808_s30 = sld [smem:[#allocation8 + $0x1]] }
  0x5b   :  { %v459_v14 = vstv %s807_s20 }
  0x5c   :  { %181 = vrot.lane.b32.xlu0 %v150_v18, %s982_s25  ;;  %134 = vrot.lane.b32.xlu1 %v133_v19, %s983_s26  ;;  %v278_v60 = vstv %s277_s21  ;;  %s809_s21 = sld [smem:[#allocation10 + $0x1]] }
  0x60   :  { %195 = vrot.lane.b32.xlu0 %v193_v22, %s980_s23  ;;  %v189_v22 = vstv %s188_s4 }
  0xc6   :  { %v152_v23 = vpop.permute.xlu0 %151  ;;  %v168_v24 = vpop.permute.xlu1 %167 }
  0xc7   :  { %v153_v25 = vrot.slane %v152_v23, 6  ;;  %v169_v27 = vrot.slane %v168_v24, 6 }
  0xc9   :  { %v155_v26 = vsel %vm154_vm4, %v153_v25, %v152_v23  ;;  %v171_v38 = vsel %vm170_vm5, %v169_v27, %v168_v24 }
  0xca   :  { %v1067_v29 = vmul.f32 %v155_v26, %v1052_v20  ;;  %v159_v30 = vpop.permute.xlu0 %158  ;;  %v175_v31 = vpop.permute.xlu1 %174  ;;  %v1093_v48 = vmul.f32 %v171_v38, %v1077_v37 }
  0xcb   :  { %v160_v33 = vrot.slane %v159_v30, 6  ;;  %v176_v34 = vrot.slane %v175_v31, 6 }
  0xcc   :  { %v203_v36 = vmul.f32 %v202_v28, %v1067_v29  ;;  %v235_v56 = vmul.f32 %v234_v51, %v1093_v48  ;;  %v400_v3 = vmul.f32 %v399_v0, %v1067_v29  ;;  %v591_v10 = vmul.f32 %v590_v8, %v1067_v29 }
  0xcd   :  { %v162_v39 = vsel %vm161_vm6, %v160_v33, %v159_v30  ;;  %v178_v40 = vsel %vm177_vm7, %v176_v34, %v175_v31  ;;  %v430_v12 = vmul.f32 %v429_v11, %v1093_v48 }
  0xce   :  { %v1082_v42 = vmul.f32 %v162_v39, %v1052_v20  ;;  %v1085_v43 = vmul.f32 %v178_v40, %v1077_v37  ;;  %205 = vrot.lane.b32.xlu1 %v203_v36, %s984_s8  ;;  %v182_v44 = vpop.permute.xlu0 %181  ;;  %v135_v16 = vpop.permute.xlu1 %134 }
  0xcf   :  { %v183_v46 = vrot.slane %v182_v44, 6  ;;  %v136_v17 = vrot.slane %v135_v16, 6 }
  0xd0   :  { %v214_v49 = vmul.f32 %v213_v41, %v1082_v42  ;;  %v246_v53 = vmul.f32 %v245_v47, %v1085_v43  ;;  %v440_v6 = vmul.f32 %v439_v4, %v1085_v43  ;;  %v410_v9 = vmul.f32 %v409_v7, %v1082_v42 }
  0xd1   :  { %v185_v50 = vsel %vm184_vm8, %v183_v46, %v182_v44  ;;  %v138_v18 = vsel %vm137_vm9, %v136_v17, %v135_v16 }
  0xd2   :  { %v1099_v52 = vmul.f32 %v185_v50, %v1077_v37  ;;  %216 = vrot.lane.b32.xlu0 %v214_v49, %s985_s10  ;;  %227 = vrot.lane.b32.xlu1 %v225_v45, %s983_s26  ;;  %v196_v19 = vpop.permute.xlu0 %195  ;;  %v1136_v21 = vmul.f32 %v138_v18, %v1052_v20 }
  0xd3   :  { %v197_v23 = vrot.slane %v196_v19, 2 }
  0xd4   :  { %v268_v58 = vmul.f32 %v267_v55, %v1099_v52  ;;  %v460_v15 = vmul.f32 %v459_v14, %v1099_v52  ;;  %v190_v24 = vmul.f32 %v189_v22, %v1136_v21 }
  0xd5   :  { %v198_v25 = vsel %vm161_vm6, %v196_v19, %v197_v23 }
  0xd6   :  { %237 = vrot.lane.b32.xlu0 %v235_v56, %s986_s13  ;;  %248 = vrot.lane.b32.xlu1 %v246_v53, %s987_s14  ;;  %v200_v28 = vadd.f32 %v198_v25, %v190_v24 }
  0xda   :  { %259 = vrot.lane.b32.xlu0 %v257_v57, %s988_s0  ;;  %270 = vrot.lane.b32.xlu1 %v268_v58, %s989_s3 }
  0xde   :  { %392 = vrot.lane.b32.xlu0 %v390_v61, %s980_s23  ;;  %422 = vrot.lane.b32.xlu1 %v420_v62, %s983_s26 }
  0xe2   :  { %452 = vrot.lane.b32.xlu0 %v450_v1, %s988_s0  ;;  %402 = vrot.lane.b32.xlu1 %v400_v3, %s984_s8 }
  0xe6   :  { %583 = vrot.lane.b32.xlu0 %v581_v5, %s980_s23  ;;  %442 = vrot.lane.b32.xlu1 %v440_v6, %s987_s14  ;;  %s811_s23 = sld [smem:[#allocation7 + $0x12]]  ;;  %v386_v6 = vstv %s799_s22  ;;  %s810_s22 = sld [smem:[#allocation11 + $0x1]] }
  0xe7   :  { %v387_v16 = vmul.f32 %v386_v6, %v1136_v21 }
  0xea   :  { %412 = vrot.lane.b32.xlu0 %v410_v9, %s985_s10  ;;  %593 = vrot.lane.b32.xlu1 %v591_v10, %s984_s8 }
  0xec   :  { %v577_v8 = vstv %s811_s23 }
  0xed   :  { %v578_v17 = vmul.f32 %v577_v8, %v1136_v21 }
  0xee   :  { %432 = vrot.lane.b32.xlu0 %v430_v12, %s986_s13 }
  0xf2   :  { %462 = vrot.lane.b32.xlu0 %v460_v15, %s989_s3 }
 0x140   :  { %v206_v26 = vpop.permute.xlu1 %205 }
 0x141   :  { %v207_v27 = vrot.slane %v206_v26, 2 }
 0x143   :  { %v209_v29 = vsel %vm208_vm10, %v206_v26, %v207_v27 }
 0x144   :  { %v217_v30 = vpop.permute.xlu0 %216  ;;  %v228_v31 = vpop.permute.xlu1 %227  ;;  %v211_v35 = vadd.f32 %v209_v29, %v200_v28 }
 0x145   :  { %v218_v33 = vrot.slane %v217_v30, 2  ;;  %v229_v34 = vrot.slane %v228_v31, 6 }
 0x147   :  { %v220_v20 = vsel %vm219_vm11, %v217_v30, %v218_v33  ;;  %v230_v40 = vsel %vm137_vm9, %v229_v34, %v228_v31  ;;  %v600_v30 = vstv %s1151_s24 }
 0x148   :  { %v222_v36 = vadd.f32 %v220_v20, %v211_v35  ;;  %v238_v38 = vpop.permute.xlu0 %237  ;;  %v249_v39 = vpop.permute.xlu1 %248 }
 0x149   :  { %v239_v41 = vrot.slane %v238_v38, 6  ;;  %v250_v44 = vrot.slane %v249_v39, 6 }
 0x14a   :  { %v232_v45 = vadd.f32 %v230_v40, %v222_v36  ;;  %v610_v36 = vstv %s1159_s27 }
 0x14b   :  { %v241_v46 = vsel %vm240_vm12, %v239_v41, %v238_v38  ;;  %v252_v51 = vsel %vm251_vm13, %v250_v44, %v249_v39  ;;  %v601_v41 = vmul.f32 %v600_v30, %v1082_v42  ;;  %v630_v42 = vstv %s1173_s28 }
 0x14c   :  { %v243_v47 = vadd.f32 %v241_v46, %v232_v45  ;;  %v260_v49 = vpop.permute.xlu0 %259  ;;  %v271_v50 = vpop.permute.xlu1 %270 }
 0x14d   :  { %v261_v53 = vrot.slane %v260_v49, 6  ;;  %v272_v54 = vrot.slane %v271_v50, 6 }
 0x14e   :  { %v254_v55 = vadd.f32 %v252_v51, %v243_v47 }
 0x14f   :  { %v263_v56 = vsel %vm262_vm14, %v261_v53, %v260_v49  ;;  %v274_v61 = vsel %vm273_vm15, %v272_v54, %v271_v50  ;;  %v611_v50 = vmul.f32 %v610_v36, %v1069_v32  ;;  %v620_v53 = vstv %s1170_s2 }
 0x150   :  { %v265_v57 = vadd.f32 %v263_v56, %v254_v55  ;;  %v393_v58 = vpop.permute.xlu0 %392  ;;  %v423_v59 = vpop.permute.xlu1 %422  ;;  %v621_v32 = vmul.f32 %v620_v53, %v1093_v48 }
 0x151   :  { %v394_v2 = vrot.slane %v393_v58, 2  ;;  %v424_v19 = vrot.slane %v423_v59, 6 }
 0x152   :  { %v276_v62 = vadd.f32 %v274_v61, %v265_v57 }
 0x153   :  { %v395_v14 = vsel %vm161_vm6, %v393_v58, %v394_v2  ;;  %v425_v34 = vsel %vm137_vm9, %v424_v19, %v423_v59  ;;  %v640_v59 = vstv %s1176_s29  ;;  %v469_v2 = vstv %s808_s30 }
 0x154   :  { %v1147_v63 = vadd.f32 %v278_v60, %v276_v62  ;;  %v1149_v0 = vpop.permute.xlu0 %452  ;;  %v403_v1 = vpop.permute.xlu1 %402  ;;  %v397_v24 = vadd.f32 %v395_v14, %v387_v16  ;;  %v631_v62 = vmul.f32 %v630_v42, %v1085_v43  ;;  %v650_v43 = vstv %s819_s6 }
 0x155   :  { %v404_v7 = vrot.slane %v403_v1, 2  ;;  %v454_v44 = vrot.slane %v1149_v0, 6  ;;  %v651_v8 = vmul.f32 %v650_v43, %v1099_v52 }
 0x156   :  { %v288_v3 = vrot.slane %v1147_v63, %v1047_v13  ;;  %v281_v4 = vcombine.high %v1147_v63, %v1147_v63  ;;  %v320_v5 = vmul.f32 %v1147_v63, %v1147_v63 }
 0x157   :  { %v405_v22 = vsel %vm208_vm10, %v403_v1, %v404_v7  ;;  %v455_v56 = vsel %vm262_vm14, %v454_v44, %v1149_v0  ;;  %v641_v1 = vmul.f32 %v640_v59, %v1077_v37 }
 0x158   :  { %v584_v9 = vpop.permute.xlu0 %583  ;;  %v443_v10 = vpop.permute.xlu1 %442  ;;  %297 = vrot.lane.b32.xlu1 %v288_v3, %s982_s25  ;;  %v296_v11 = vcombine.high %v288_v3, %v288_v3  ;;  %v329_v12 = vrot.slane %v320_v5, %v1047_v13  ;;  %v295_v18 = vrot.slane %v281_v4, %v1047_v13  ;;  %v407_v31 = vadd.f32 %v405_v22, %v397_v24 }
 0x159   :  { %v585_v15 = vrot.slane %v584_v9, 2  ;;  %v322_v33 = vcombine.high %v320_v5, %v320_v5  ;;  %v444_v45 = vrot.slane %v443_v10, 6 }
 0x15a   :  { %299 = vrot.lane.b32.xlu0 %v296_v11, %s982_s25  ;;  %v337_v21 = vcombine.high %v329_v12, %v329_v12 }
 0x15b   :  { %v586_v23 = vsel %vm161_vm6, %v584_v9, %v585_v15  ;;  %v336_v49 = vrot.slane %v322_v33, %v1047_v13  ;;  %v445_v57 = vsel %vm251_vm13, %v444_v45, %v443_v10 }
 0x15c   :  { %v588_v25 = vadd.f32 %v586_v23, %v578_v17  ;;  %v413_v26 = vpop.permute.xlu0 %412  ;;  %v594_v27 = vpop.permute.xlu1 %593  ;;  %301 = vrot.lane.b32.xlu1 %v295_v18, %s982_s25 }
 0x15d   :  { %v414_v28 = vrot.slane %v413_v26, 2  ;;  %v595_v29 = vrot.slane %v594_v27, 2 }
 0x15e   :  { %340 = vrot.lane.b32.xlu0 %v337_v21, %s982_s25 }
 0x15f   :  { %v415_v35 = vsel %vm219_vm11, %v413_v26, %v414_v28  ;;  %v596_v20 = vsel %vm208_vm10, %v594_v27, %v595_v29 }
 0x160   :  { %v417_v38 = vadd.f32 %v415_v35, %v407_v31  ;;  %v1183_v39 = vadd.f32 %v596_v20, %v588_v25  ;;  %v433_v40 = vpop.permute.xlu0 %432  ;;  %338 = vrot.lane.b32.xlu1 %v329_v12, %s982_s25 }
 0x161   :  { %v434_v46 = vrot.slane %v433_v40, 6 }
 0x162   :  { %v427_v47 = vadd.f32 %v425_v34, %v417_v38  ;;  %603 = vrot.lane.b32.xlu0 %v601_v41, %s985_s10 }
 0x163   :  { %v435_v51 = vsel %vm240_vm12, %v434_v46, %v433_v40 }
 0x164   :  { %v437_v54 = vadd.f32 %v435_v51, %v427_v47  ;;  %v463_v55 = vpop.permute.xlu0 %462  ;;  %342 = vrot.lane.b32.xlu1 %v336_v49, %s982_s25 }
 0x165   :  { %v464_v58 = vrot.slane %v463_v55, 6 }
 0x166   :  { %v447_v60 = vadd.f32 %v445_v57, %v437_v54  ;;  %613 = vrot.lane.b32.xlu0 %v611_v50, %s983_s26  ;;  %s820_s26 = sld [smem:[#allocation8 + $0x2]] }
 0x167   :  { %v465_v3 = vsel %vm273_vm15, %v464_v58, %v463_v55 }
 0x168   :  { %v457_v61 = vadd.f32 %v455_v56, %v447_v60  ;;  %623 = vrot.lane.b32.xlu1 %v621_v32, %s986_s13  ;;  %s368_s13 = sld [smem:[#allocation10]] }
 0x16a   :  { %v467_v0 = vadd.f32 %v465_v3, %v457_v61  ;;  %633 = vrot.lane.b32.xlu0 %v631_v62, %s987_s14  ;;  %s374_s14 = sld [smem:[#allocation11]] }
 0x16c   :  { %v1206_v4 = vadd.f32 %v469_v2, %v467_v0  ;;  %643 = vrot.lane.b32.xlu1 %v641_v1, %s988_s0  ;;  %v660_v56 = vstv %s820_s26 }
 0x16e   :  { %v479_v48 = vrot.slane %v1206_v4, %v1047_v13  ;;  %v472_v5 = vcombine.high %v1206_v4, %v1206_v4  ;;  %v510_v7 = vmul.f32 %v1206_v4, %v1206_v4 }
 0x170   :  { %488 = vrot.lane.b32.xlu1 %v479_v48, %s982_s25  ;;  %v487_v37 = vcombine.high %v479_v48, %v479_v48  ;;  %v486_v6 = vrot.slane %v472_v5, %v1047_v13  ;;  %v519_v9 = vrot.slane %v510_v7, %v1047_v13  ;;  %v512_v40 = vcombine.high %v510_v7, %v510_v7 }
 0x172   :  { %490 = vrot.lane.b32.xlu0 %v487_v37, %s982_s25  ;;  %v526_v47 = vrot.slane %v512_v40, %v1047_v13  ;;  %v527_v60 = vcombine.high %v519_v9, %v519_v9 }
 0x174   :  { %492 = vrot.lane.b32.xlu1 %v486_v6, %s982_s25 }
 0x176   :  { %653 = vrot.lane.b32.xlu0 %v651_v8, %s989_s3 }
 0x178   :  { %528 = vrot.lane.b32.xlu1 %v519_v9, %s982_s25 }
 0x1ca   :  { %v298_v10 = vpop.permute.xlu1 %297 }
 0x1cc   :  { %v300_v11 = vpop.permute.xlu0 %299 }
 0x1cd   :  { %v303_v12 = vsel %vm184_vm8, %v298_v10, %v300_v11 }
 0x1ce   :  { %v302_v14 = vpop.permute.xlu1 %301  ;;  %v308_v17 = vsel %vm307_vm0, %v303_v12, 0.0 }
 0x1cf   :  { %v304_v15 = vsel %vm184_vm8, %v300_v11, %v302_v14 }
 0x1d0   :  { %v341_v16 = vpop.permute.xlu0 %340  ;;  %v309_v18 = vsel %vm307_vm0, %v304_v15, 0.0 }
 0x1d1   :  { %v310_v52 = vadd.f32 %v309_v18, %v308_v17 }
 0x1d2   :  { %v339_v19 = vpop.permute.xlu1 %338 }
 0x1d3   :  { %311 = vadd.xlane.f32.xlu1 %v310_v52  ;;  %v344_v23 = vsel %vm184_vm8, %v339_v19, %v341_v16 }
 0x1d4   :  { %v604_v22 = vpop.permute.xlu0 %603  ;;  %v348_v21 = vsel %vm307_vm0, %v344_v23, 0.0 }
 0x1d5   :  { %v605_v24 = vrot.slane %v604_v22, 2 }
 0x1d6   :  { %v343_v25 = vpop.permute.xlu1 %342 }
 0x1d7   :  { %v345_v26 = vsel %vm184_vm8, %v341_v16, %v343_v25  ;;  %v606_v29 = vsel %vm219_vm11, %v604_v22, %v605_v24 }
 0x1d8   :  { %v614_v27 = vpop.permute.xlu0 %613  ;;  %v349_v28 = vsel %vm307_vm0, %v345_v26, 0.0  ;;  %v608_v20 = vadd.f32 %v606_v29, %v1183_v39 }
 0x1d9   :  { %v615_v30 = vrot.slane %v614_v27, 6  ;;  %v350_v31 = vadd.f32 %v349_v28, %v348_v21 }
 0x1da   :  { %v624_v33 = vpop.permute.xlu1 %623 }
 0x1db   :  { %v616_v34 = vsel %vm137_vm9, %v615_v30, %v614_v27  ;;  %v625_v35 = vrot.slane %v624_v33, 6  ;;  %351 = vadd.xlane.f32.xlu0 %v350_v31 }
 0x1dc   :  { %v634_v36 = vpop.permute.xlu0 %633  ;;  %v618_v38 = vadd.f32 %v616_v34, %v608_v20 }
 0x1dd   :  { %v626_v41 = vsel %vm240_vm12, %v625_v35, %v624_v33  ;;  %v635_v44 = vrot.slane %v634_v36, 6 }
 0x1de   :  { %v644_v45 = vpop.permute.xlu1 %643  ;;  %v628_v46 = vadd.f32 %v626_v41, %v618_v38 }
 0x1df   :  { %v636_v49 = vsel %vm251_vm13, %v635_v44, %v634_v36  ;;  %v645_v50 = vrot.slane %v644_v45, 6 }
 0x1e0   :  { %v638_v53 = vadd.f32 %v636_v49, %v628_v46 }
 0x1e1   :  { %v646_v39 = vsel %vm262_vm14, %v645_v50, %v644_v45 }
 0x1e2   :  { %v648_v42 = vadd.f32 %v646_v39, %v638_v53  ;;  %v489_v2 = vpop.permute.xlu1 %488 }
 0x1e4   :  { %v491_v51 = vpop.permute.xlu0 %490  ;;  %532 = vrot.lane.b32.xlu1 %v526_v47, %s982_s25 }
 0x1e5   :  { %v494_v48 = vsel %vm184_vm8, %v489_v2, %v491_v51 }
 0x1e6   :  { %v493_v3 = vpop.permute.xlu1 %492  ;;  %v498_v37 = vsel %vm307_vm0, %v494_v48, 0.0 }
 0x1e7   :  { %v495_v0 = vsel %vm184_vm8, %v491_v51, %v493_v3 }
 0x1e8   :  { %v654_v54 = vpop.permute.xlu0 %653  ;;  %v499_v5 = vsel %vm307_vm0, %v495_v0, 0.0 }
 0x1e9   :  { %v655_v55 = vrot.slane %v654_v54, 6  ;;  %v500_v43 = vadd.f32 %v499_v5, %v498_v37 }
 0x1ea   :  { %v529_v9 = vpop.permute.xlu1 %528 }
 0x1eb   :  { %v656_v57 = vsel %vm273_vm15, %v655_v55, %v654_v54 }
 0x1ec   :  { %v658_v58 = vadd.f32 %v656_v57, %v648_v42  ;;  %v375_v57 = vstv %s374_s14 }
 0x1ee   :  { %v1240_v59 = vadd.f32 %v660_v56, %v658_v58 }
 0x1f0   :  { %v670_v32 = vrot.slane %v1240_v59, %v1047_v13  ;;  %v701_v62 = vmul.f32 %v1240_v59, %v1240_v59  ;;  %v663_v6 = vcombine.high %v1240_v59, %v1240_v59 }
 0x1f1   :  { %530 = vrot.lane.b32.xlu0 %v527_v60, %s982_s25 }
 0x1f2   :  { %v678_v61 = vcombine.high %v670_v32, %v670_v32  ;;  %v710_v1 = vrot.slane %v701_v62, %v1047_v13  ;;  %v677_v7 = vrot.slane %v663_v6, %v1047_v13  ;;  %v703_v33 = vcombine.high %v701_v62, %v701_v62 }
 0x1f4   :  { %681 = vrot.lane.b32.xlu1 %v678_v61, %s982_s25  ;;  %v718_v8 = vcombine.high %v710_v1, %v710_v1  ;;  %v717_v34 = vrot.slane %v703_v33, %v1047_v13 }
 0x1f8   :  { %719 = vrot.lane.b32.xlu1 %v710_v1, %s982_s25 }
 0x210   :  { %501 = vadd.xlane.f32.xlu0 %v500_v43 }
 0x226   :  { %679 = vrot.lane.b32.xlu0 %v670_v32, %s982_s25 }
 0x22a   :  { %683 = vrot.lane.b32.xlu0 %v677_v7, %s982_s25 }
 0x22e   :  { %721 = vrot.lane.b32.xlu0 %v718_v8, %s982_s25 }
 0x260   :  { %v312_v10 = vpop.xlane.xlu1 %311 }
 0x261   :  { %v313_v11 = vrot.slane %v312_v10, 4 }
 0x263   :  { %v314_v12 = vadd.f32 %v313_v11, %v312_v10 }
 0x264   :  { %v533_v22 = vpop.permute.xlu1 %532 }
 0x265   :  { %v315_v14 = vrot.slane %v314_v12, 2 }
 0x267   :  { %v316_v15 = vadd.f32 %v315_v14, %v314_v12 }
 0x268   :  { %v352_v16 = vpop.xlane.xlu0 %351  ;;  %v682_v36 = vpop.permute.xlu1 %681 }
 0x269   :  { %v353_v17 = vrot.slane %v352_v16, 4  ;;  %v317_v18 = vrot.slane %v316_v15, 1 }
 0x26b   :  { %v354_v52 = vadd.f32 %v353_v17, %v352_v16  ;;  %v318_v19 = vadd.f32 %v317_v18, %v316_v15 }
 0x26c   :  { %v531_v23 = vpop.permute.xlu0 %530  ;;  %v720_v61 = vpop.permute.xlu1 %719 }
 0x26d   :  { %v355_v24 = vrot.slane %v354_v52, 2  ;;  %v534_v25 = vsel %vm184_vm8, %v529_v9, %v531_v23  ;;  %v535_v26 = vsel %vm184_vm8, %v531_v23, %v533_v22  ;;  %823 = vpush %v318_v19 }
 0x26e   :  { %v538_v27 = vsel %vm307_vm0, %v534_v25, 0.0  ;;  %v539_v21 = vsel %vm307_vm0, %v535_v26, 0.0 }
 0x26f   :  { %v540_v28 = vadd.f32 %v539_v21, %v538_v27  ;;  %v356_v29 = vadd.f32 %v355_v24, %v354_v52  ;;  %v565_v27 = vstv %s810_s22 }
 0x271   :  { %541 = vadd.xlane.f32.xlu1 %v540_v28  ;;  %v357_v30 = vrot.slane %v356_v29, 1 }
 0x273   :  { %v358_v31 = vadd.f32 %v357_v30, %v356_v29 }
 0x275   :  { %825 = vpush %v358_v31 }
 0x282   :  { %723 = vrot.lane.b32.xlu1 %v717_v34, %s982_s25 }
 0x29d   :  { %v502_v35 = vpop.xlane.xlu0 %501 }
 0x29e   :  { %s824_s7 = spop %823  ;;  %v503_v38 = vrot.slane %v502_v35, 4 }
 0x29f   :  { %s1266_s8 = smul.f32 0.001953125, %s824_s7  ;;  %s821_s7 = sld [smem:[#allocation10 + $0x2]] }
 0x2a0   :  { %v504_v46 = vadd.f32 %v503_v38, %v502_v35 }
 0x2a1   :  { %v680_v20 = vpop.permute.xlu0 %679  ;;  %s362_s9 = smul.f32 %s1266_s8, %s1266_s8  ;;  %v370_v55 = vstv %s1266_s8  ;;  %s822_s8 = sld [smem:[#allocation11 + $0x2]] }
 0x2a2   :  { %v685_v40 = vsel %vm184_vm8, %v680_v20, %v682_v36  ;;  %v505_v49 = vrot.slane %v504_v46, 2  ;;  %v371_v42 = vsub.f32 %v1147_v63, %v370_v55 }
 0x2a3   :  { %v689_v13 = vsel %vm307_vm0, %v685_v40, 0.0 }
 0x2a4   :  { %v506_v51 = vadd.f32 %v505_v49, %v504_v46 }
 0x2a5   :  { %v684_v41 = vpop.permute.xlu0 %683 }
 0x2a6   :  { %v686_v44 = vsel %vm184_vm8, %v682_v36, %v684_v41  ;;  %s826_s1 = spop %825  ;;  %v507_v53 = vrot.slane %v506_v51, 1 }
 0x2a7   :  { %s361_s10 = smul.f32 0.001953125, %s826_s1  ;;  %v690_v45 = vsel %vm307_vm0, %v686_v44, 0.0 }
 0x2a8   :  { %v691_v47 = vadd.f32 %v690_v45, %v689_v13  ;;  %v508_v54 = vadd.f32 %v507_v53, %v506_v51 }
 0x2a9   :  { %s363_s11 = ssub.f32 %s361_s10, %s362_s9  ;;  %v722_v62 = vpop.permute.xlu0 %721  ;;  %s990_s10 = smov [#allocation13]  }
 0x2aa   :  { %692 = vadd.xlane.f32.xlu0 %v691_v47  ;;  %v725_v3 = vsel %vm184_vm8, %v720_v61, %v722_v62  ;;  %v756_v47 = vstv %s822_s8 }
 0x2ab   :  { %s364_s12 = sadd.f32 1e-05, %s363_s11  ;;  %v729_v63 = vsel %vm307_vm0, %v725_v3, 0.0  ;;  %s772_s11 = sshll.u32 %s990_s10, 4  ;;  %s773_s11 = int_to_ptr.vmem [resolvable:$true] %s772_s11 }
 0x2ac   :  { %p944_p1 = scmp.lt.s32.totalorder %s773_s11, %s773_s11 }
 0x2ad   :  { %v365_v50 = vstv %s364_s12  ;;  %s939_s12 = scalar_lea.vmem %s773_s11, 192 }
 0x2ae   :  { %863 = vrsqrt.f32 %v365_v50  ;;  %p940_p0 = scmp.ne.s32.totalorder %s773_s11, %s939_s12  ;;  %p945_p2 = scmp.lt.s32.totalorder %s939_s12, %s939_s12 }
 0x2b0   :  { %p946_p3 = por %p945_p2, %p944_p1 }
 0x2b2   :  { %p947_p4 = pnand %p946_p3, %p940_p0 }
 0x2b8   :  { %v864_v39 = vpop.eup %863 }
 0x2b9   :  { %827 = vpush %v864_v39 }
 0x2ba   :  { %829 = vpush %v508_v54 }
 0x2ea   :  { %s828_s15 = spop %827 }
 0x2eb   :  { %s369_s16 = smul.f32 %s828_s15, %s368_s13  ;;  %s830_s0 = spop %829 }
 0x2ec   :  { %s550_s3 = smul.f32 0.001953125, %s830_s0 }
 0x2ed   :  { %v372_v56 = vstv %s369_s16 }
 0x2ee   :  { %v373_v58 = vmul.f32 %v372_v56, %v371_v42  ;;  %s552_s17 = smul.f32 %s550_s3, %s550_s3  ;;  %v560_v24 = vstv %s550_s3 }
 0x2ef   :  { %v561_v25 = vsub.f32 %v1206_v4, %v560_v24 }
 0x2f0   :  { %v376_v60 = vadd.f32 %v375_v57, %v373_v58 }
 0x2f2   :  { %v377_v32 = vmax.f32 %v376_v60, 0.0 }
 0x2f4   :  { %379 = vrot.lane.b32.xlu0 %v377_v32, %s982_s25 }
 0x2fe   :  { %v542_v1 = vpop.xlane.xlu1 %541 }
 0x2ff   :  { %v543_v2 = vrot.slane %v542_v1, 4 }
 0x301   :  { %v544_v0 = vadd.f32 %v543_v2, %v542_v1 }
 0x302   :  { %v724_v48 = vpop.permute.xlu1 %723 }
 0x303   :  { %v545_v5 = vrot.slane %v544_v0, 2  ;;  %v726_v37 = vsel %vm184_vm8, %v722_v62, %v724_v48 }
 0x304   :  { %v730_v43 = vsel %vm307_vm0, %v726_v37, 0.0 }
 0x305   :  { %v731_v6 = vadd.f32 %v730_v43, %v729_v63  ;;  %v546_v7 = vadd.f32 %v545_v5, %v544_v0 }
 0x307   :  { %732 = vadd.xlane.f32.xlu1 %v731_v6  ;;  %v547_v8 = vrot.slane %v546_v7, 1 }
 0x309   :  { %v548_v9 = vadd.f32 %v547_v8, %v546_v7 }
 0x30b   :  { %831 = vpush %v548_v9 }
 0x337   :  { %v693_v10 = vpop.xlane.xlu0 %692 }
 0x338   :  { %v694_v11 = vrot.slane %v693_v10, 4 }
 0x33a   :  { %v695_v12 = vadd.f32 %v694_v11, %v693_v10 }
 0x33c   :  { %s832_s18 = spop %831  ;;  %v696_v14 = vrot.slane %v695_v12, 2 }
 0x33d   :  { %s551_s19 = smul.f32 0.001953125, %s832_s18 }
 0x33e   :  { %v697_v16 = vadd.f32 %v696_v14, %v695_v12 }
 0x33f   :  { %s553_s20 = ssub.f32 %s551_s19, %s552_s17 }
 0x340   :  { %v698_v17 = vrot.slane %v697_v16, 1 }
 0x341   :  { %s554_s4 = sadd.f32 1e-05, %s553_s20 }
 0x342   :  { %v699_v52 = vadd.f32 %v698_v17, %v697_v16 }
 0x343   :  { %v555_v15 = vstv %s554_s4 }
 0x344   :  { %865 = vrsqrt.f32 %v555_v15 }
 0x34e   :  { %v866_v18 = vpop.eup %865 }
 0x34f   :  { %833 = vpush %v866_v18 }
 0x350   :  { %835 = vpush %v699_v52 }
 0x366   :  { %v380_v19 = vpop.permute.xlu0 %379 }
 0x367   :  { %v381_v22 = vrot.slane %v380_v19, 2 }
 0x369   :  { %v382_v23 = vsel %vm184_vm8, %v380_v19, %v381_v22 }
 0x36a   :  { %384 = vst [vmem:[#allocation13] sm:$0xf] %v382_v23 }
 0x380   :  { %s834_s23 = spop %833 }
 0x381   :  { %s559_s24 = smul.f32 %s834_s23, %s809_s21  ;;  %s836_s27 = spop %835 }
 0x382   :  { %s741_s2 = smul.f32 0.001953125, %s836_s27 }
 0x383   :  { %v562_v26 = vstv %s559_s24 }
 0x384   :  { %v563_v21 = vmul.f32 %v562_v26, %v561_v25  ;;  %s743_s28 = smul.f32 %s741_s2, %s741_s2  ;;  %v751_v13 = vstv %s741_s2 }
 0x385   :  { %v752_v45 = vsub.f32 %v1240_v59, %v751_v13 }
 0x386   :  { %v566_v28 = vadd.f32 %v565_v27, %v563_v21 }
 0x388   :  { %v567_v29 = vmax.f32 %v566_v28, 0.0 }
 0x38a   :  { %569 = vrot.lane.b32.xlu1 %v567_v29, %s982_s25 }
 0x394   :  { %v733_v30 = vpop.xlane.xlu1 %732 }
 0x395   :  { %v734_v31 = vrot.slane %v733_v30, 4 }
 0x397   :  { %v735_v33 = vadd.f32 %v734_v31, %v733_v30 }
 0x399   :  { %v736_v34 = vrot.slane %v735_v33, 2 }
 0x39b   :  { %v737_v35 = vadd.f32 %v736_v34, %v735_v33 }
 0x39d   :  { %v738_v20 = vrot.slane %v737_v35, 1 }
 0x39f   :  { %v739_v36 = vadd.f32 %v738_v20, %v737_v35 }
 0x3a1   :  { %837 = vpush %v739_v36 }
 0x3d2   :  { %s838_s29 = spop %837 }
 0x3d3   :  { %s742_s30 = smul.f32 0.001953125, %s838_s29 }
 0x3d5   :  { %s744_s6 = ssub.f32 %s742_s30, %s743_s28 }
 0x3d7   :  { %s745_s26 = sadd.f32 1e-05, %s744_s6 }
 0x3d9   :  { %v746_v4 = vstv %s745_s26 }
 0x3da   :  { %867 = vrsqrt.f32 %v746_v4 }
 0x3e4   :  { %v868_v38 = vpop.eup %867 }
 0x3e5   :  { %839 = vpush %v868_v38 }
 0x3fc   :  { %v570_v40 = vpop.permute.xlu1 %569 }
 0x3fd   :  { %v571_v41 = vrot.slane %v570_v40, 2 }
 0x3ff   :  { %v572_v44 = vsel %vm184_vm8, %v570_v40, %v571_v41 }
 0x400   :  { %575 = vst [vmem:[#allocation13 + $0x4] sm:$0xf] %v572_v44 }
 0x416   :  { %s840_s9 = spop %839 }
 0x417   :  { %s750_s1 = smul.f32 %s840_s9, %s821_s7 }
 0x419   :  { %v753_v46 = vstv %s750_s1 }
 0x41a   :  { %v754_v49 = vmul.f32 %v753_v46, %v752_v45 }
 0x41c   :  { %v757_v50 = vadd.f32 %v756_v47, %v754_v49 }
 0x41e   :  { %v758_v51 = vmax.f32 %v757_v50, 0.0 }
 0x420   :  { %760 = vrot.lane.b32.xlu0 %v758_v51, %s982_s25 }
 0x492   :  { %v761_v53 = vpop.permute.xlu0 %760 }
 0x493   :  { %v762_v39 = vrot.slane %v761_v53, 2 }
 0x495   :  { %v763_v54 = vsel %vm184_vm8, %v761_v53, %v762_v39 }
 0x496   :  { %766 = vst [vmem:[#allocation13 + $0x8] sm:$0xf] %v763_v54 }
 0x497   :  { %950 = shalt.err (!%p947_p4)
}
 0x498   :  { %s951_s15 = scalar_lea.hbm %s1305_s5, 192 }
 0x499   :  { %p952_p5 = scmp.ne.s32.totalorder %s1305_s5, %s951_s15  ;;  %p955_p6 = scmp.lt.u32.totalorder %s951_s15, %s1305_s5 }
 0x49b   :  { %p957_p7 = pnand %p955_p6, %p952_p5 }
 0x49d   :  { %960 = shalt.err (!%p957_p7)
}
 0x49e   :  { %s991_s17 = smov 64   ;;  %s992_s18 = smov 4  }
 0x49f   :  { %778 = dma.vmem_to_hbm [thread:$0]  %s773_s11, 192, %s1305_s5, [#allocation5], %s991_s17, %s991_s17, %s992_s18  }
 0x4a0   :  { %969 = dma.done.wait [#allocation5], 192  }
 0x4a1   :  { %970 = vsyncadd [#allocation5], 4294967104 }
 0x4a2   :  { %782 = vsyncpa [#allocation4], 1 }
 0x4a3   :  { %783 = vsyncpa [#allocation5], 1 }
 0x4a4   :  { %784 = vsyncpa [#allocation6], 1 }
 0x4a5   :  { %785 = vsyncpa [#allocation9], 1 }
 0x4a6   :  { %786 = vsyncpa [#allocation12], 1 }

</bundles_post_ra>
